<compile_context>
chip_gen: v5e
topology: v5e:2x2
jax: 0.10.0
libtpu: 0.0.40
codegen_flags: <defaults>
</compile_context>

<pallas_src>
from functools import partial

import jax
import jax.numpy as jnp
import numpy as np
from jax import lax
from jax.experimental import pallas as pl
from jax.experimental.pallas import tpu as pltpu


def _round_up(x, m):
    return ((x + m - 1) // m) * m


def _simple_rnn_kernel(ids_ref, len_ref, eproj_ref, w_hh_ref, b_ref,
                       w_fc_ref, b_fc_ref, out_ref, gates_ref):
    """Fused (embedding@W_ih) lookup + tanh-RNN recurrence + linear head.

    ids_ref:   (T*Bp, 1) int32   token ids, time-major rows (row = t*Bp + b)
    len_ref:   (Bp, 1)   int32   per-sequence valid lengths (0 for pad rows)
    eproj_ref: (Vp, H)   bf16    fused table  embedding @ W_ih^T  (zero pad rows)
    w_hh_ref:  (H, H)    bf16    hidden-to-hidden weight, pre-transposed (in,out)
    b_ref:     (1, H)    f32     b_ih + b_hh (pre-summed)
    w_fc_ref:  (H, Op)   bf16    fc weight, pre-transposed + zero-padded to 128 lanes
    b_fc_ref:  (1, Op)   f32     fc bias, zero-padded
    out_ref:   (Bp, Op)  f32     fc(h at t = lengths-1)
    gates_ref: (T*Bp, H) f32     VMEM scratch: hoisted  x @ W_ih + b  for all steps
    """
    TB = ids_ref.shape[0]
    V_pad, H = eproj_ref.shape
    B = len_ref.shape[0]
    T = TB // B

    # ---- Hoisted (non-recurrent) work: ONE batched MXU pass over all T*Bp rows.
    # Embedding lookup + input projection fused: one_hot @ (emb @ W_ih^T) + b.
    ids = ids_ref[...]                                              # (T*Bp, 1)
    vocab_iota = lax.broadcasted_iota(jnp.int32, (TB, V_pad), 1)
    one_hot = (vocab_iota == ids).astype(jnp.bfloat16)              # (T*Bp, Vp)
    gates_ref[...] = (
        jnp.dot(one_hot, eproj_ref[...],
                preferred_element_type=jnp.float32)
        + b_ref[...])                                               # (T*Bp, H) f32

    # ---- Serial recurrence: only  tanh(gates[t] + h @ W_hh)  on the critical path.
    w_hh = w_hh_ref[...]                                            # bf16, stays staged
    lengths = len_ref[...]                                          # (Bp, 1)

    def step(t, h):                                                 # h: (Bp, H) bf16
        row = pl.multiple_of(t * B, B)
        g_x = gates_ref[pl.ds(row, B), :]                           # (Bp, H) f32
        g = g_x + jnp.dot(h, w_hh, preferred_element_type=jnp.float32)
        h_new = jnp.tanh(g).astype(jnp.bfloat16)                    # single cast/step
        # packed-sequence semantics: freeze h[b] once t >= lengths[b].
        return jnp.where(t < lengths, h_new, h)

    h0 = jnp.zeros((B, H), jnp.bfloat16)
    # T is small & static: full unroll so LLO can overlap MXU / EUP / VPU slots.
    h_last = lax.fori_loop(0, T, step, h0, unroll=True)

    # ---- Linear head on the last valid hidden state (lane-dense Op=128 store).
    out_ref[...] = (
        jnp.dot(h_last, w_fc_ref[...], preferred_element_type=jnp.float32)
        + b_fc_ref[...]).astype(out_ref.dtype)


@partial(jax.jit, static_argnames=("num_classes",))
def simple_rnn_forward(token_ids, lengths, params, num_classes):
    """token_ids: (B, T) int32, lengths: (B,) int32 — same API as the PyTorch module."""
    B, T = token_ids.shape
    V_pad, H = params["emb_proj"].shape
    O_pad = params["w_fc_t"].shape[1]
    B_pad = max(8, _round_up(B, 8))          # full sublane width

    # Tiny int32 layout plumbing only; all float work happens inside the kernel.
    ids_pad = jnp.zeros((B_pad, T), jnp.int32).at[:B].set(token_ids.astype(jnp.int32))
    len_pad = jnp.zeros((B_pad, 1), jnp.int32).at[:B, 0].set(lengths.astype(jnp.int32))
    ids_col = jnp.transpose(ids_pad).reshape(T * B_pad, 1)          # time-major rows

    out = pl.pallas_call(
        _simple_rnn_kernel,
        out_shape=jax.ShapeDtypeStruct((B_pad, O_pad), jnp.float32),
        grid_spec=pltpu.PrefetchScalarGridSpec(
            num_scalar_prefetch=0,
            grid=(1,),
            in_specs=[
                pl.BlockSpec((T * B_pad, 1), lambda i: (0, 0)),   # token ids
                pl.BlockSpec((B_pad, 1), lambda i: (0, 0)),       # lengths
                pl.BlockSpec((V_pad, H), lambda i: (0, 0)),       # fused emb@W_ih (bf16)
                pl.BlockSpec((H, H), lambda i: (0, 0)),           # W_hh^T (bf16)
                pl.BlockSpec((1, H), lambda i: (0, 0)),           # b_ih + b_hh (f32)
                pl.BlockSpec((H, O_pad), lambda i: (0, 0)),       # W_fc^T padded (bf16)
                pl.BlockSpec((1, O_pad), lambda i: (0, 0)),       # b_fc padded (f32)
            ],
            out_specs=pl.BlockSpec((B_pad, O_pad), lambda i: (0, 0)),
            scratch_shapes=[pltpu.VMEM((T * B_pad, H), jnp.float32)],
        ),
        compiler_params=pltpu.CompilerParams(
            dimension_semantics=("arbitrary",)),
    )(ids_col, len_pad, params["emb_proj"], params["w_hh_t"], params["b"],
      params["w_fc_t"], params["b_fc"])

    return out[:B, :num_classes]


def init_params(key, vocab_size, embed_dim, hidden_dim, num_classes):
    """PyTorch-equivalent init (nn.Embedding ~ N(0,1); nn.RNN / nn.Linear ~
    U(-1/sqrt(H), 1/sqrt(H))), pre-packed for the kernel:
      * embedding and W_ih folded into one (V_pad, H) bf16 table,
      * W_hh / W_fc pre-transposed to (in, out), cast to bf16 once,
      * biases pre-summed / zero-padded, kept f32,
      * vocab padded to 128, fc output padded to 128 lanes.
    Returns (kernel_params, ref_params) where ref_params are the raw f32 weights."""
    k = jax.random.split(key, 7)
    bound = 1.0 / np.sqrt(hidden_dim)
    u = lambda kk, shape: jax.random.uniform(kk, shape, jnp.float32, -bound, bound)

    emb = jax.random.normal(k[0], (vocab_size, embed_dim), jnp.float32)
    w_ih = u(k[1], (hidden_dim, embed_dim))        # PyTorch layout (H, E)
    w_hh = u(k[2], (hidden_dim, hidden_dim))       # (H, H)
    b_ih = u(k[3], (hidden_dim,))
    b_hh = u(k[4], (hidden_dim,))
    w_fc = u(k[5], (num_classes, hidden_dim))      # (O, H)
    b_fc = u(k[6], (num_classes,))

    V_pad = max(128, _round_up(vocab_size, 128))
    O_pad = max(128, _round_up(num_classes, 128))

    # Fold embedding lookup and input projection into one table (f32 math, bf16 store).
    emb_proj = emb @ w_ih.T                                        # (V, H) f32
    emb_proj_p = jnp.zeros((V_pad, hidden_dim), jnp.float32).at[:vocab_size].set(emb_proj)
    w_fc_p = jnp.zeros((hidden_dim, O_pad), jnp.float32).at[:, :num_classes].set(w_fc.T)
    b_fc_p = jnp.zeros((1, O_pad), jnp.float32).at[0, :num_classes].set(b_fc)

    kernel_params = {
        "emb_proj": emb_proj_p.astype(jnp.bfloat16),               # (V_pad, H)
        "w_hh_t": w_hh.T.astype(jnp.bfloat16),                     # (H, H)
        "b": (b_ih + b_hh).reshape(1, hidden_dim),                 # (1, H) f32
        "w_fc_t": w_fc_p.astype(jnp.bfloat16),                     # (H, O_pad)
        "b_fc": b_fc_p,                                            # (1, O_pad) f32
    }
    ref_params = {"embedding": emb, "w_ih": w_ih, "w_hh": w_hh,
                  "b_ih": b_ih, "b_hh": b_hh, "w_fc": w_fc, "b_fc": b_fc}
    return kernel_params, ref_params


def _reference_forward(token_ids, lengths, ref):
    """Pure-JAX, all-f32, unfused reference of the PyTorch SimpleRNN forward."""
    x = ref["embedding"][token_ids]                      # (B, T, E)
    B, T = token_ids.shape
    H = ref["w_hh"].shape[0]
    b = ref["b_ih"] + ref["b_hh"]
    h = jnp.zeros((B, H), jnp.float32)
    for t in range(T):
        h_new = jnp.tanh(x[:, t, :] @ ref["w_ih"].T + h @ ref["w_hh"].T + b)
        h = jnp.where((t < lengths)[:, None], h_new, h)  # freeze after length
    return h @ ref["w_fc"].T + ref["b_fc"]


if __name__ == "__main__":
    VOCAB, EMBED, HIDDEN, NUM_CLASSES = 64, 64, 128, 2   # module defaults for E/H/O
    B, T = 2, 8

    key = jax.random.PRNGKey(0)
    k_param, k_ids = jax.random.split(key, 2)

    params, ref_params = init_params(k_param, VOCAB, EMBED, HIDDEN, NUM_CLASSES)
    token_ids = jax.random.randint(k_ids, (B, T), 0, VOCAB, dtype=jnp.int32)
    lengths = jnp.array([T, 5], dtype=jnp.int32)         # variable-length padded batch

    out = simple_rnn_forward(token_ids, lengths, params, num_classes=NUM_CLASSES)
    out = jax.block_until_ready(out)

    ref = _reference_forward(token_ids, lengths, ref_params)
    # Kernel uses a bf16 fused table + bf16 recurrence operands (f32 accumulation)
    # vs a true all-f32 unfused reference: tolerance sized for bf16 weight/activation
    # rounding compounded over T tanh steps.
    np.testing.assert_allclose(np.asarray(out), np.asarray(ref),
                               rtol=5e-2, atol=5e-2)

    print("KERNEL_OK")
</pallas_src>

<mosaic_0001>
module attributes {stable_mosaic.version = 11 : i64} {
  func.func @_simple_rnn_kernel(%arg0: i32, %arg1: memref<64x1xi32, #tpu.memory_space<vmem>>, %arg2: memref<8x1xi32, #tpu.memory_space<vmem>>, %arg3: memref<128x128xbf16, #tpu.memory_space<vmem>>, %arg4: memref<128x128xbf16, #tpu.memory_space<vmem>>, %arg5: memref<1x128xf32, #tpu.memory_space<vmem>>, %arg6: memref<128x128xbf16, #tpu.memory_space<vmem>>, %arg7: memref<1x128xf32, #tpu.memory_space<vmem>>, %arg8: memref<8x128xf32, #tpu.memory_space<vmem>>, %arg9: memref<64x128xf32, #tpu.memory_space<vmem>>) attributes {dimension_semantics = [#tpu.dimension_semantics<arbitrary>], iteration_bounds = array<i64: 1>, scalar_prefetch = 0 : i64, scratch_operands = 1 : i64, tpu.core_type = #tpu.core_type<tc>, window_params = [{pipeline_mode = #tpu.pipeline_mode<synchronous>, transform_indices = @transform_0, window_bounds = array<i64: 64, 1>}, {pipeline_mode = #tpu.pipeline_mode<synchronous>, transform_indices = @transform_1, window_bounds = array<i64: 8, 1>}, {pipeline_mode = #tpu.pipeline_mode<synchronous>, transform_indices = @transform_2, window_bounds = array<i64: 128, 128>}, {pipeline_mode = #tpu.pipeline_mode<synchronous>, transform_indices = @transform_3, window_bounds = array<i64: 128, 128>}, {pipeline_mode = #tpu.pipeline_mode<synchronous>, transform_indices = @transform_4, window_bounds = array<i64: 1, 128>}, {pipeline_mode = #tpu.pipeline_mode<synchronous>, transform_indices = @transform_5, window_bounds = array<i64: 128, 128>}, {pipeline_mode = #tpu.pipeline_mode<synchronous>, transform_indices = @transform_6, window_bounds = array<i64: 1, 128>}, {pipeline_mode = #tpu.pipeline_mode<synchronous>, transform_indices = @transform_7, window_bounds = array<i64: 8, 128>}]} {
    %c0 = arith.constant 0 : index
    %c0_0 = arith.constant 0 : index
    %0 = vector.load %arg1[%c0, %c0_0] : memref<64x1xi32, #tpu.memory_space<vmem>>, vector<64x1xi32>
    %1 = tpu.iota {dimensions = array<i32: 1>} : vector<64x128xi32>
    %2 = vector.broadcast %0 : vector<64x1xi32> to vector<64x128xi32>
    %3 = arith.cmpi eq, %1, %2 : vector<64x128xi32>
    %4 = arith.extui %3 : vector<64x128xi1> to vector<64x128xi32>
    %5 = arith.sitofp %4 : vector<64x128xi32> to vector<64x128xf32>
    %6 = arith.truncf %5 : vector<64x128xf32> to vector<64x128xbf16>
    %c0_1 = arith.constant 0 : index
    %c0_2 = arith.constant 0 : index
    %7 = vector.load %arg3[%c0_1, %c0_2] : memref<128x128xbf16, #tpu.memory_space<vmem>>, vector<128x128xbf16>
    %cst = arith.constant dense<0.000000e+00> : vector<64x128xf32>
    %8 = tpu.matmul %6, %7, %cst {dimension_numbers = #tpu.dot_dimension_numbers<[1], [0], [0], [1], [0, 0, 1, 1], [], []>} : vector<64x128xbf16>, vector<128x128xbf16>, vector<64x128xf32> -> vector<64x128xf32>
    %c0_3 = arith.constant 0 : index
    %c0_4 = arith.constant 0 : index
    %9 = vector.load %arg5[%c0_3, %c0_4] : memref<1x128xf32, #tpu.memory_space<vmem>>, vector<1x128xf32>
    %10 = vector.broadcast %9 : vector<1x128xf32> to vector<64x128xf32>
    %11 = arith.addf %8, %10 : vector<64x128xf32>
    %c0_5 = arith.constant 0 : index
    %c0_6 = arith.constant 0 : index
    %12 = vector.load %arg9[%c0_5, %c0_6] : memref<64x128xf32, #tpu.memory_space<vmem>>, vector<64x128xf32>
    tpu.vector_store %arg9[%c0_5, %c0_6], %11 {strides = array<i32>} : memref<64x128xf32, #tpu.memory_space<vmem>>, vector<64x128xf32>,
    %c0_7 = arith.constant 0 : index
    %c0_8 = arith.constant 0 : index
    %13 = vector.load %arg4[%c0_7, %c0_8] : memref<128x128xbf16, #tpu.memory_space<vmem>>, vector<128x128xbf16>
    %c0_9 = arith.constant 0 : index
    %c0_10 = arith.constant 0 : index
    %14 = vector.load %arg2[%c0_9, %c0_10] : memref<8x1xi32, #tpu.memory_space<vmem>>, vector<8x1xi32>
    %cst_11 = arith.constant 0.000000e+00 : bf16
    %15 = vector.broadcast %cst_11 : bf16 to vector<8x128xbf16>
    %c0_i32 = arith.constant 0 : i32
    %c8_i32 = arith.constant 8 : i32
    %16 = arith.muli %c0_i32, %c8_i32 : i32
    %17 = tpu.assume_multiple %16, 8 : i32
    %18 = arith.index_cast %17 : i32 to index
    %c0_12 = arith.constant 0 : index
    %19 = vector.load %arg9[%18, %c0_12] : memref<64x128xf32, #tpu.memory_space<vmem>>, vector<8x128xf32>
    %cst_13 = arith.constant dense<0.000000e+00> : vector<8x128xf32>
    %20 = tpu.matmul %15, %13, %cst_13 {dimension_numbers = #tpu.dot_dimension_numbers<[1], [0], [0], [1], [0, 0, 1, 1], [], []>} : vector<8x128xbf16>, vector<128x128xbf16>, vector<8x128xf32> -> vector<8x128xf32>
    %21 = arith.addf %19, %20 : vector<8x128xf32>
    %22 = math.tanh %21 : vector<8x128xf32>
    %23 = arith.truncf %22 : vector<8x128xf32> to vector<8x128xbf16>
    %24 = vector.broadcast %c0_i32 : i32 to vector<8x1xi32>
    %25 = arith.cmpi slt, %24, %14 : vector<8x1xi32>
    %26 = vector.shape_cast %25 : vector<8x1xi1> to vector<8x1xi1>
    %27 = vector.broadcast %26 : vector<8x1xi1> to vector<8x128xi1>
    %28 = arith.select %27, %23, %15 : vector<8x128xi1>, vector<8x128xbf16>
    %c1_i32 = arith.constant 1 : i32
    %c8_i32_14 = arith.constant 8 : i32
    %29 = arith.muli %c1_i32, %c8_i32_14 : i32
    %30 = tpu.assume_multiple %29, 8 : i32
    %31 = arith.index_cast %30 : i32 to index
    %c0_15 = arith.constant 0 : index
    %32 = vector.load %arg9[%31, %c0_15] : memref<64x128xf32, #tpu.memory_space<vmem>>, vector<8x128xf32>
    %cst_16 = arith.constant dense<0.000000e+00> : vector<8x128xf32>
    %33 = tpu.matmul %28, %13, %cst_16 {dimension_numbers = #tpu.dot_dimension_numbers<[1], [0], [0], [1], [0, 0, 1, 1], [], []>} : vector<8x128xbf16>, vector<128x128xbf16>, vector<8x128xf32> -> vector<8x128xf32>
    %34 = arith.addf %32, %33 : vector<8x128xf32>
    %35 = math.tanh %34 : vector<8x128xf32>
    %36 = arith.truncf %35 : vector<8x128xf32> to vector<8x128xbf16>
    %37 = vector.broadcast %c1_i32 : i32 to vector<8x1xi32>
    %38 = arith.cmpi slt, %37, %14 : vector<8x1xi32>
    %39 = vector.shape_cast %38 : vector<8x1xi1> to vector<8x1xi1>
    %40 = vector.broadcast %39 : vector<8x1xi1> to vector<8x128xi1>
    %41 = arith.select %40, %36, %28 : vector<8x128xi1>, vector<8x128xbf16>
    %c2_i32 = arith.constant 2 : i32
    %c8_i32_17 = arith.constant 8 : i32
    %42 = arith.muli %c2_i32, %c8_i32_17 : i32
    %43 = tpu.assume_multiple %42, 8 : i32
    %44 = arith.index_cast %43 : i32 to index
    %c0_18 = arith.constant 0 : index
    %45 = vector.load %arg9[%44, %c0_18] : memref<64x128xf32, #tpu.memory_space<vmem>>, vector<8x128xf32>
    %cst_19 = arith.constant dense<0.000000e+00> : vector<8x128xf32>
    %46 = tpu.matmul %41, %13, %cst_19 {dimension_numbers = #tpu.dot_dimension_numbers<[1], [0], [0], [1], [0, 0, 1, 1], [], []>} : vector<8x128xbf16>, vector<128x128xbf16>, vector<8x128xf32> -> vector<8x128xf32>
    %47 = arith.addf %45, %46 : vector<8x128xf32>
    %48 = math.tanh %47 : vector<8x128xf32>
    %49 = arith.truncf %48 : vector<8x128xf32> to vector<8x128xbf16>
    %50 = vector.broadcast %c2_i32 : i32 to vector<8x1xi32>
    %51 = arith.cmpi slt, %50, %14 : vector<8x1xi32>
    %52 = vector.shape_cast %51 : vector<8x1xi1> to vector<8x1xi1>
    %53 = vector.broadcast %52 : vector<8x1xi1> to vector<8x128xi1>
    %54 = arith.select %53, %49, %41 : vector<8x128xi1>, vector<8x128xbf16>
    %c3_i32 = arith.constant 3 : i32
    %c8_i32_20 = arith.constant 8 : i32
    %55 = arith.muli %c3_i32, %c8_i32_20 : i32
    %56 = tpu.assume_multiple %55, 8 : i32
    %57 = arith.index_cast %56 : i32 to index
    %c0_21 = arith.constant 0 : index
    %58 = vector.load %arg9[%57, %c0_21] : memref<64x128xf32, #tpu.memory_space<vmem>>, vector<8x128xf32>
    %cst_22 = arith.constant dense<0.000000e+00> : vector<8x128xf32>
    %59 = tpu.matmul %54, %13, %cst_22 {dimension_numbers = #tpu.dot_dimension_numbers<[1], [0], [0], [1], [0, 0, 1, 1], [], []>} : vector<8x128xbf16>, vector<128x128xbf16>, vector<8x128xf32> -> vector<8x128xf32>
    %60 = arith.addf %58, %59 : vector<8x128xf32>
    %61 = math.tanh %60 : vector<8x128xf32>
    %62 = arith.truncf %61 : vector<8x128xf32> to vector<8x128xbf16>
    %63 = vector.broadcast %c3_i32 : i32 to vector<8x1xi32>
    %64 = arith.cmpi slt, %63, %14 : vector<8x1xi32>
    %65 = vector.shape_cast %64 : vector<8x1xi1> to vector<8x1xi1>
    %66 = vector.broadcast %65 : vector<8x1xi1> to vector<8x128xi1>
    %67 = arith.select %66, %62, %54 : vector<8x128xi1>, vector<8x128xbf16>
    %c4_i32 = arith.constant 4 : i32
    %c8_i32_23 = arith.constant 8 : i32
    %68 = arith.muli %c4_i32, %c8_i32_23 : i32
    %69 = tpu.assume_multiple %68, 8 : i32
    %70 = arith.index_cast %69 : i32 to index
    %c0_24 = arith.constant 0 : index
    %71 = vector.load %arg9[%70, %c0_24] : memref<64x128xf32, #tpu.memory_space<vmem>>, vector<8x128xf32>
    %cst_25 = arith.constant dense<0.000000e+00> : vector<8x128xf32>
    %72 = tpu.matmul %67, %13, %cst_25 {dimension_numbers = #tpu.dot_dimension_numbers<[1], [0], [0], [1], [0, 0, 1, 1], [], []>} : vector<8x128xbf16>, vector<128x128xbf16>, vector<8x128xf32> -> vector<8x128xf32>
    %73 = arith.addf %71, %72 : vector<8x128xf32>
    %74 = math.tanh %73 : vector<8x128xf32>
    %75 = arith.truncf %74 : vector<8x128xf32> to vector<8x128xbf16>
    %76 = vector.broadcast %c4_i32 : i32 to vector<8x1xi32>
    %77 = arith.cmpi slt, %76, %14 : vector<8x1xi32>
    %78 = vector.shape_cast %77 : vector<8x1xi1> to vector<8x1xi1>
    %79 = vector.broadcast %78 : vector<8x1xi1> to vector<8x128xi1>
    %80 = arith.select %79, %75, %67 : vector<8x128xi1>, vector<8x128xbf16>
    %c5_i32 = arith.constant 5 : i32
    %c8_i32_26 = arith.constant 8 : i32
    %81 = arith.muli %c5_i32, %c8_i32_26 : i32
    %82 = tpu.assume_multiple %81, 8 : i32
    %83 = arith.index_cast %82 : i32 to index
    %c0_27 = arith.constant 0 : index
    %84 = vector.load %arg9[%83, %c0_27] : memref<64x128xf32, #tpu.memory_space<vmem>>, vector<8x128xf32>
    %cst_28 = arith.constant dense<0.000000e+00> : vector<8x128xf32>
    %85 = tpu.matmul %80, %13, %cst_28 {dimension_numbers = #tpu.dot_dimension_numbers<[1], [0], [0], [1], [0, 0, 1, 1], [], []>} : vector<8x128xbf16>, vector<128x128xbf16>, vector<8x128xf32> -> vector<8x128xf32>
    %86 = arith.addf %84, %85 : vector<8x128xf32>
    %87 = math.tanh %86 : vector<8x128xf32>
    %88 = arith.truncf %87 : vector<8x128xf32> to vector<8x128xbf16>
    %89 = vector.broadcast %c5_i32 : i32 to vector<8x1xi32>
    %90 = arith.cmpi slt, %89, %14 : vector<8x1xi32>
    %91 = vector.shape_cast %90 : vector<8x1xi1> to vector<8x1xi1>
    %92 = vector.broadcast %91 : vector<8x1xi1> to vector<8x128xi1>
    %93 = arith.select %92, %88, %80 : vector<8x128xi1>, vector<8x128xbf16>
    %c6_i32 = arith.constant 6 : i32
    %c8_i32_29 = arith.constant 8 : i32
    %94 = arith.muli %c6_i32, %c8_i32_29 : i32
    %95 = tpu.assume_multiple %94, 8 : i32
    %96 = arith.index_cast %95 : i32 to index
    %c0_30 = arith.constant 0 : index
    %97 = vector.load %arg9[%96, %c0_30] : memref<64x128xf32, #tpu.memory_space<vmem>>, vector<8x128xf32>
    %cst_31 = arith.constant dense<0.000000e+00> : vector<8x128xf32>
    %98 = tpu.matmul %93, %13, %cst_31 {dimension_numbers = #tpu.dot_dimension_numbers<[1], [0], [0], [1], [0, 0, 1, 1], [], []>} : vector<8x128xbf16>, vector<128x128xbf16>, vector<8x128xf32> -> vector<8x128xf32>
    %99 = arith.addf %97, %98 : vector<8x128xf32>
    %100 = math.tanh %99 : vector<8x128xf32>
    %101 = arith.truncf %100 : vector<8x128xf32> to vector<8x128xbf16>
    %102 = vector.broadcast %c6_i32 : i32 to vector<8x1xi32>
    %103 = arith.cmpi slt, %102, %14 : vector<8x1xi32>
    %104 = vector.shape_cast %103 : vector<8x1xi1> to vector<8x1xi1>
    %105 = vector.broadcast %104 : vector<8x1xi1> to vector<8x128xi1>
    %106 = arith.select %105, %101, %93 : vector<8x128xi1>, vector<8x128xbf16>
    %c7_i32 = arith.constant 7 : i32
    %c8_i32_32 = arith.constant 8 : i32
    %107 = arith.muli %c7_i32, %c8_i32_32 : i32
    %108 = tpu.assume_multiple %107, 8 : i32
    %109 = arith.index_cast %108 : i32 to index
    %c0_33 = arith.constant 0 : index
    %110 = vector.load %arg9[%109, %c0_33] : memref<64x128xf32, #tpu.memory_space<vmem>>, vector<8x128xf32>
    %cst_34 = arith.constant dense<0.000000e+00> : vector<8x128xf32>
    %111 = tpu.matmul %106, %13, %cst_34 {dimension_numbers = #tpu.dot_dimension_numbers<[1], [0], [0], [1], [0, 0, 1, 1], [], []>} : vector<8x128xbf16>, vector<128x128xbf16>, vector<8x128xf32> -> vector<8x128xf32>
    %112 = arith.addf %110, %111 : vector<8x128xf32>
    %113 = math.tanh %112 : vector<8x128xf32>
    %114 = arith.truncf %113 : vector<8x128xf32> to vector<8x128xbf16>
    %115 = vector.broadcast %c7_i32 : i32 to vector<8x1xi32>
    %116 = arith.cmpi slt, %115, %14 : vector<8x1xi32>
    %117 = vector.shape_cast %116 : vector<8x1xi1> to vector<8x1xi1>
    %118 = vector.broadcast %117 : vector<8x1xi1> to vector<8x128xi1>
    %119 = arith.select %118, %114, %106 : vector<8x128xi1>, vector<8x128xbf16>
    %c8_i32_35 = arith.constant 8 : i32
    %c0_36 = arith.constant 0 : index
    %c0_37 = arith.constant 0 : index
    %120 = vector.load %arg6[%c0_36, %c0_37] : memref<128x128xbf16, #tpu.memory_space<vmem>>, vector<128x128xbf16>
    %cst_38 = arith.constant dense<0.000000e+00> : vector<8x128xf32>
    %121 = tpu.matmul %119, %120, %cst_38 {dimension_numbers = #tpu.dot_dimension_numbers<[1], [0], [0], [1], [0, 0, 1, 1], [], []>} : vector<8x128xbf16>, vector<128x128xbf16>, vector<8x128xf32> -> vector<8x128xf32>
    %c0_39 = arith.constant 0 : index
    %c0_40 = arith.constant 0 : index
    %122 = vector.load %arg7[%c0_39, %c0_40] : memref<1x128xf32, #tpu.memory_space<vmem>>, vector<1x128xf32>
    %123 = vector.broadcast %122 : vector<1x128xf32> to vector<8x128xf32>
    %124 = arith.addf %121, %123 : vector<8x128xf32>
    %c0_41 = arith.constant 0 : index
    %c0_42 = arith.constant 0 : index
    %125 = vector.load %arg8[%c0_41, %c0_42] : memref<8x128xf32, #tpu.memory_space<vmem>>, vector<8x128xf32>
    tpu.vector_store %arg8[%c0_41, %c0_42], %124 {strides = array<i32>} : memref<8x128xf32, #tpu.memory_space<vmem>>, vector<8x128xf32>,
    return
  }
  func.func @transform_0(%arg0: i32) -> (i32, i32) {
    %c0_i32 = arith.constant 0 : i32
    %c0_i32_0 = arith.constant 0 : i32
    %c0_i32_1 = arith.constant 0 : i32
    return %c0_i32, %c0_i32_0 : i32, i32
  }
  func.func @transform_1(%arg0: i32) -> (i32, i32) {
    %c0_i32 = arith.constant 0 : i32
    %c0_i32_0 = arith.constant 0 : i32
    %c0_i32_1 = arith.constant 0 : i32
    return %c0_i32, %c0_i32_0 : i32, i32
  }
  func.func @transform_2(%arg0: i32) -> (i32, i32) {
    %c0_i32 = arith.constant 0 : i32
    %c0_i32_0 = arith.constant 0 : i32
    %c0_i32_1 = arith.constant 0 : i32
    return %c0_i32, %c0_i32_0 : i32, i32
  }
  func.func @transform_3(%arg0: i32) -> (i32, i32) {
    %c0_i32 = arith.constant 0 : i32
    %c0_i32_0 = arith.constant 0 : i32
    %c0_i32_1 = arith.constant 0 : i32
    return %c0_i32, %c0_i32_0 : i32, i32
  }
  func.func @transform_4(%arg0: i32) -> (i32, i32) {
    %c0_i32 = arith.constant 0 : i32
    %c0_i32_0 = arith.constant 0 : i32
    %c0_i32_1 = arith.constant 0 : i32
    return %c0_i32, %c0_i32_0 : i32, i32
  }
  func.func @transform_5(%arg0: i32) -> (i32, i32) {
    %c0_i32 = arith.constant 0 : i32
    %c0_i32_0 = arith.constant 0 : i32
    %c0_i32_1 = arith.constant 0 : i32
    return %c0_i32, %c0_i32_0 : i32, i32
  }
  func.func @transform_6(%arg0: i32) -> (i32, i32) {
    %c0_i32 = arith.constant 0 : i32
    %c0_i32_0 = arith.constant 0 : i32
    %c0_i32_1 = arith.constant 0 : i32
    return %c0_i32, %c0_i32_0 : i32, i32
  }
  func.func @transform_7(%arg0: i32) -> (i32, i32) {
    %c0_i32 = arith.constant 0 : i32
    %c0_i32_0 = arith.constant 0 : i32
    %c0_i32_1 = arith.constant 0 : i32
    return %c0_i32, %c0_i32_0 : i32, i32
  }
}

</mosaic_0001>

<bundles_post_ra>
// kernel: simple_rnn_forward.1
= control target key start
LH: loop header
LB: loop body
LE: loop exit
PB: predicated region body
PF: predicated region fallthrough
CT: control target
= control target key end

     0   :  { %12 = vsyncpa [#allocation4], 0  ;;  %s1025_s0 = inlined_call_operand.vmem [shape: s32[64,1], index: 0, kind: input, shape index: {}]   ;;  %s1026_s1 = inlined_call_operand.vmem [shape: s32[8,1], index: 1, kind: input, shape index: {}]   ;;  %s1027_s2 = inlined_call_operand.vmem [shape: bf16[128,128], index: 2, kind: input, shape index: {}]   ;;  %s1028_s3 = inlined_call_operand.hbm [shape: bf16[128,128], index: 3, kind: input, shape index: {}]   ;;  %s1029_s4 = inlined_call_operand.vmem [shape: f32[1,128], index: 4, kind: input, shape index: {}]   ;;  %s1030_s5 = inlined_call_operand.hbm [shape: bf16[128,128], index: 5, kind: input, shape index: {}]   ;;  %s1031_s6 = inlined_call_operand.vmem [shape: f32[1,128], index: 6, kind: input, shape index: {}]   ;;  %s1032_s7 = inlined_call_operand.vmem [shape: f32[8,128], index: 7, kind: output, shape index: {}]  }
   0x1   :  { %s24_s26 = sshll.u32 %s1028_s3, 4  ;;  %s25_s26 = int_to_ptr.hbm [resolvable:$true] %s24_s26 }
   0x2   :  { %13 = vsyncpa [#allocation6], 0  ;;  %s801_s27 = smov [#allocation3]   ;;  %s39_s8 = sshll.u32 %s1030_s5, 4  ;;  %s40_s8 = int_to_ptr.hbm [resolvable:$true] %s39_s8 }
   0x3   :  { %s26_s28 = sshll.u32 %s801_s27, 4  ;;  %s802_s9 = smov 64   ;;  %s27_s28 = int_to_ptr.vmem [resolvable:$true] %s26_s28 }
   0x4   :  { %s803_s10 = smov 4   ;;  %s804_s11 = smov [#allocation5]  }
   0x5   :  { %32 = dma.hbm_to_vmem [thread:$0]  %s25_s26, 1024, %s27_s28, [#allocation4], %s802_s9, %s802_s9, %s803_s10  }
   0x6   :  { %s41_s12 = sshll.u32 %s804_s11, 4  ;;  %s42_s12 = int_to_ptr.vmem [resolvable:$true] %s41_s12 }
   0x7   :  { %47 = dma.hbm_to_vmem [thread:$0]  %s40_s8, 1024, %s42_s12, [#allocation6], %s802_s9, %s802_s9, %s803_s10  }
   0x8   :  { %797 = dma.done.wait [#allocation4], 1024  }
   0x9   :  { %798 = vsyncadd [#allocation4], 4294966272 }
   0xa   :  { %799 = dma.done.wait [#allocation6], 1024  }
   0xb   :  { %800 = vsyncadd [#allocation6], 4294966272  ;;  %v805_v0 = vmov 0   ;;  %v59_v1 = vld [vmem:[%s1025_s0] sm:$0xff]  ;;  %v61_v2 = vld [vmem:[%s1025_s0 + $0x10] sm:$0xff]  ;;  %v67_v34 = vlaneseq }
   0xc   :  { %728 = vset.pattern.permute.xlu0 %v805_v0  ;;  %730 = vset.pattern.permute.xlu2 %v805_v0  ;;  %v60_v3 = vld [vmem:[%s1025_s0 + $0x8] sm:$0xff]  ;;  %v62_v4 = vld [vmem:[%s1025_s0 + $0x18] sm:$0xff]  ;;  %v871_v5 = vld [vmem:[%s1026_s1] sm:$0xff]  ;;  %v806_v38 = vmov 1.0|1.0  }
   0xd   :  { %729 = vset.pattern.permute.xlu1 %v805_v0  ;;  %70 = vperm.xlu0 %728, %v59_v1   ;;  %v873_v6 = vld [vmem:[#allocation3 + $0x38] sm:$0xff]  ;;  %vm360_vm0 = vcmp.gt.s32.totalorder %v871_v5, 2  ;;  %v880_v8 = vld [vmem:[#allocation3 + $0x30] sm:$0xff]  ;;  %v63_v11 = vld [vmem:[%s1025_s0 + $0x20] sm:$0xff]  ;;  %vm490_vm1 = vcmp.gt.s32.totalorder %v871_v5, 7  ;;  %vm308_vm2 = vcmp.gt.s32.totalorder %v871_v5, 0 }
   0xe   :  { %76 = vperm.xlu2 %730, %v61_v2   ;;  %v705_v7 = vld [vmem:[%s1027_s2 + $0x38] sm:$0xff]  ;;  %292 = vmatpush.bf16.msra.mxu1 %v873_v6  ;;  %v704_v9 = vld [vmem:[%s1027_s2 + $0x30] sm:$0xff]  ;;  %v361_v10 = vsel %vm360_vm0, 1, %v805_v0  ;;  %v892_v12 = vld [vmem:[#allocation3 + $0x28] sm:$0xff]  ;;  %v491_v24 = vsel %vm490_vm1, 1, %v805_v0  ;;  %v309_v25 = vsel %vm308_vm2, 1, %v805_v0 }
   0xf   :  { %318 = vmatpush.bf16.msra.mxu2 %v873_v6  ;;  %189 = vmatpush.bf16.msra.mxu0 %v705_v7  ;;  %v703_v13 = vld [vmem:[%s1027_s2 + $0x28] sm:$0xff]  ;;  %v900_v14 = vld [vmem:[#allocation3 + $0x20] sm:$0xff]  ;;  %v65_v17 = vld [vmem:[%s1025_s0 + $0x30] sm:$0xff]  ;;  %vm334_vm3 = vcmp.gt.s32.totalorder %v871_v5, 1  ;;  %vm386_vm4 = vcmp.gt.s32.totalorder %v871_v5, 3  ;;  %vm412_vm5 = vcmp.gt.s32.totalorder %v871_v5, 4 }
  0x10   :  { %344 = vmatpush.bf16.msra.mxu3 %v873_v6  ;;  %v702_v15 = vld [vmem:[%s1027_s2 + $0x20] sm:$0xff]  ;;  %v64_v16 = vld [vmem:[%s1025_s0 + $0x28] sm:$0xff]  ;;  %v914_v18 = vld [vmem:[#allocation3 + $0x18] sm:$0xff]  ;;  %311 = vperm.xlu1 %729, %v309_v25   ;;  %v335_v29 = vsel %vm334_vm3, 1, %v805_v0  ;;  %v387_v30 = vsel %vm386_vm4, 1, %v805_v0  ;;  %v413_v31 = vsel %vm412_vm5, 1, %v805_v0 }
  0x11   :  { %v701_v19 = vld [vmem:[%s1027_s2 + $0x18] sm:$0xff]  ;;  %v922_v20 = vld [vmem:[#allocation3 + $0x10] sm:$0xff]  ;;  %v933_v23 = vld [vmem:[#allocation3 + $0x8] sm:$0xff]  ;;  %vm438_vm6 = vcmp.gt.s32.totalorder %v871_v5, 5  ;;  %v68_v35 = vand.u32 127, %v67_v34  ;;  %vm464_vm5 = vcmp.gt.s32.totalorder %v871_v5, 6 }
  0x12   :  { %293 = vmatpush.bf16.msra.mxu1 %v880_v8  ;;  %v700_v21 = vld [vmem:[%s1027_s2 + $0x10] sm:$0xff]  ;;  %v66_v22 = vld [vmem:[%s1025_s0 + $0x38] sm:$0xff]  ;;  %v944_v26 = vld [vmem:[#allocation3] sm:$0xff]  ;;  %v439_v33 = vsel %vm438_vm6, 1, %v805_v0  ;;  %v465_v55 = vsel %vm464_vm5, 1, %v805_v0 }
  0x13   :  { %319 = vmatpush.bf16.msra.mxu2 %v880_v8  ;;  %190 = vmatpush.bf16.msra.mxu0 %v704_v9  ;;  %v699_v27 = vld [vmem:[%s1027_s2 + $0x8] sm:$0xff]  ;;  %v698_v28 = vld [vmem:[%s1027_s2] sm:$0xff] }
  0x14   :  { %345 = vmatpush.bf16.msra.mxu3 %v880_v8  ;;  %v1007_v47 = vld [vmem:[%s1029_s4] ss:$0 sm:$0xff] }
  0x15   :  { %73 = vperm.xlu0 %728, %v60_v3  }
  0x16   :  { %79 = vperm.xlu2 %730, %v62_v4   ;;  %294 = vmatpush.bf16.msra.mxu1 %v892_v12 }
  0x17   :  { %320 = vmatpush.bf16.msra.mxu2 %v892_v12  ;;  %191 = vmatpush.bf16.msra.mxu0 %v703_v13 }
  0x18   :  { %346 = vmatpush.bf16.msra.mxu3 %v892_v12  ;;  %337 = vperm.xlu1 %729, %v335_v29  }
  0x1a   :  { %295 = vmatpush.bf16.msra.mxu1 %v900_v14 }
  0x1b   :  { %321 = vmatpush.bf16.msra.mxu2 %v900_v14  ;;  %192 = vmatpush.bf16.msra.mxu0 %v702_v15 }
  0x1c   :  { %347 = vmatpush.bf16.msra.mxu3 %v900_v14 }
  0x1d   :  { %363 = vperm.xlu0 %728, %v361_v10  }
  0x1e   :  { %82 = vperm.xlu2 %730, %v63_v11   ;;  %296 = vmatpush.bf16.msra.mxu1 %v914_v18 }
  0x1f   :  { %322 = vmatpush.bf16.msra.mxu2 %v914_v18  ;;  %193 = vmatpush.bf16.msra.mxu0 %v701_v19 }
  0x20   :  { %348 = vmatpush.bf16.msra.mxu3 %v914_v18  ;;  %389 = vperm.xlu1 %729, %v387_v30  }
  0x22   :  { %297 = vmatpush.bf16.msra.mxu1 %v922_v20 }
  0x23   :  { %323 = vmatpush.bf16.msra.mxu2 %v922_v20  ;;  %194 = vmatpush.bf16.msra.mxu0 %v700_v21 }
  0x24   :  { %349 = vmatpush.bf16.msra.mxu3 %v922_v20 }
  0x25   :  { %85 = vperm.xlu0 %728, %v64_v16  }
  0x26   :  { %88 = vperm.xlu2 %730, %v65_v17   ;;  %298 = vmatpush.bf16.msra.mxu1 %v933_v23 }
  0x27   :  { %324 = vmatpush.bf16.msra.mxu2 %v933_v23  ;;  %195 = vmatpush.bf16.msra.mxu0 %v699_v27 }
  0x28   :  { %350 = vmatpush.bf16.msra.mxu3 %v933_v23  ;;  %415 = vperm.xlu1 %729, %v413_v31  }
  0x2a   :  { %299 = vmatpush.bf16.msra.mxu1 %v944_v26 }
  0x2b   :  { %325 = vmatpush.bf16.msra.mxu2 %v944_v26  ;;  %196 = vmatpush.bf16.msra.mxu0 %v698_v28 }
  0x2c   :  { %351 = vmatpush.bf16.msra.mxu3 %v944_v26 }
  0x2d   :  { %91 = vperm.xlu0 %728, %v66_v22   ;;  %300 = vmatmul.bf16.vlgmr.msra.gmra.mxu1 %v805_v0 }
  0x2e   :  { %370 = vmatpush.bf16.msrb.mxu1 %v873_v6  ;;  %467 = vperm.xlu2 %730, %v465_v55  }
  0x2f   :  { %396 = vmatpush.bf16.msrb.mxu2 %v873_v6  ;;  %448 = vmatpush.bf16.msrb.mxu0 %v873_v6 }
  0x30   :  { %422 = vmatpush.bf16.msrb.mxu3 %v873_v6  ;;  %441 = vperm.xlu1 %729, %v439_v33  }
  0x32   :  { %371 = vmatpush.bf16.msrb.mxu1 %v880_v8 }
  0x33   :  { %397 = vmatpush.bf16.msrb.mxu2 %v880_v8  ;;  %449 = vmatpush.bf16.msrb.mxu0 %v880_v8 }
  0x34   :  { %423 = vmatpush.bf16.msrb.mxu3 %v880_v8 }
  0x35   :  { %493 = vperm.xlu0 %728, %v491_v24  }
  0x36   :  { %372 = vmatpush.bf16.msrb.mxu1 %v892_v12 }
  0x37   :  { %398 = vmatpush.bf16.msrb.mxu2 %v892_v12  ;;  %450 = vmatpush.bf16.msrb.mxu0 %v892_v12 }
  0x38   :  { %424 = vmatpush.bf16.msrb.mxu3 %v892_v12 }
  0x3a   :  { %373 = vmatpush.bf16.msrb.mxu1 %v900_v14 }
  0x3b   :  { %399 = vmatpush.bf16.msrb.mxu2 %v900_v14  ;;  %451 = vmatpush.bf16.msrb.mxu0 %v900_v14 }
  0x3c   :  { %425 = vmatpush.bf16.msrb.mxu3 %v900_v14 }
  0x3e   :  { %374 = vmatpush.bf16.msrb.mxu1 %v914_v18 }
  0x3f   :  { %400 = vmatpush.bf16.msrb.mxu2 %v914_v18  ;;  %452 = vmatpush.bf16.msrb.mxu0 %v914_v18 }
  0x40   :  { %426 = vmatpush.bf16.msrb.mxu3 %v914_v18 }
  0x42   :  { %375 = vmatpush.bf16.msrb.mxu1 %v922_v20 }
  0x43   :  { %401 = vmatpush.bf16.msrb.mxu2 %v922_v20  ;;  %453 = vmatpush.bf16.msrb.mxu0 %v922_v20 }
  0x44   :  { %427 = vmatpush.bf16.msrb.mxu3 %v922_v20 }
  0x46   :  { %376 = vmatpush.bf16.msrb.mxu1 %v933_v23 }
  0x47   :  { %402 = vmatpush.bf16.msrb.mxu2 %v933_v23  ;;  %454 = vmatpush.bf16.msrb.mxu0 %v933_v23 }
  0x48   :  { %428 = vmatpush.bf16.msrb.mxu3 %v933_v23 }
  0x4a   :  { %377 = vmatpush.bf16.msrb.mxu1 %v944_v26 }
  0x4b   :  { %403 = vmatpush.bf16.msrb.mxu2 %v944_v26  ;;  %455 = vmatpush.bf16.msrb.mxu0 %v944_v26 }
  0x4c   :  { %429 = vmatpush.bf16.msrb.mxu3 %v944_v26 }
  0x4e   :  { %474 = vmatpush.bf16.msra.mxu1 %v873_v6 }
  0x52   :  { %475 = vmatpush.bf16.msra.mxu1 %v880_v8 }
  0x56   :  { %476 = vmatpush.bf16.msra.mxu1 %v892_v12 }
  0x5a   :  { %477 = vmatpush.bf16.msra.mxu1 %v900_v14 }
  0x5e   :  { %478 = vmatpush.bf16.msra.mxu1 %v914_v18 }
  0x62   :  { %479 = vmatpush.bf16.msra.mxu1 %v922_v20 }
  0x66   :  { %480 = vmatpush.bf16.msra.mxu1 %v933_v23 }
  0x68   :  { %v77_v37 = vpop.permute.xlu2 %76 }
  0x69   :  { %vm95_vm10 = vcmp.eq.s32.totalorder %v68_v35, %v77_v37 }
  0x6a   :  { %481 = vmatpush.bf16.msra.mxu1 %v944_v26 }
  0x70   :  { %v80_v39 = vpop.permute.xlu2 %79 }
  0x71   :  { %vm96_vm11 = vcmp.eq.s32.totalorder %v68_v35, %v80_v39  ;;  %v719_v39 = vld [vmem:[#allocation5 + $0x28] sm:$0xff] }
  0x72   :  { %vm628_vm12 = vmpackc.low %vm96_vm11, %vm95_vm10 }
  0x78   :  { %v83_v41 = vpop.permute.xlu2 %82 }
  0x79   :  { %vm97_vm13 = vcmp.eq.s32.totalorder %v68_v35, %v83_v41 }
  0x7f   :  { %v71_v32 = vpop.permute.xlu0 %70 }
  0x80   :  { %vm93_vm7 = vcmp.eq.s32.totalorder %v68_v35, %v71_v32  ;;  %v89_v43 = vpop.permute.xlu2 %88 }
  0x81   :  { %vm99_vm0 = vcmp.eq.s32.totalorder %v68_v35, %v89_v43 }
  0x82   :  { %v312_v51 = vpop.permute.xlu1 %311 }
  0x83   :  { %vm313_vm3 = vcmp.eq.s32.totalorder %v312_v51, 1 }
  0x84   :  { %vm314_vm4 = vmpackc.low %vm313_vm3, %vm313_vm3 }
  0x87   :  { %v74_v36 = vpop.permute.xlu0 %73 }
  0x88   :  { %vm94_vm8 = vcmp.eq.s32.totalorder %v68_v35, %v74_v36  ;;  %v721_v36 = vld [vmem:[#allocation5 + $0x38] sm:$0xff] }
  0x89   :  { %vm626_vm9 = vmpackc.low %vm94_vm8, %vm93_vm7 }
  0x8a   :  { %627 = vmatmul.msk.bf16.vlgmr.msra.gmra.mxu0 %vm626_vm9, %v806_v38  ;;  %v338_v60 = vpop.permute.xlu1 %337 }
  0x8b   :  { %vm339_vm6 = vcmp.eq.s32.totalorder %v338_v60, 1 }
  0x8c   :  { %vm340_vm7 = vmpackc.low %vm339_vm6, %vm339_vm6 }
  0x8f   :  { %v364_v40 = vpop.permute.xlu0 %363 }
  0x90   :  { %vm365_vm8 = vcmp.eq.s32.totalorder %v364_v40, 1  ;;  %v718_v40 = vld [vmem:[#allocation5 + $0x20] sm:$0xff] }
  0x91   :  { %vm366_vm9 = vmpackc.low %vm365_vm8, %vm365_vm8 }
  0x92   :  { %v390_v13 = vpop.permute.xlu1 %389 }
  0x93   :  { %vm391_vm10 = vcmp.eq.s32.totalorder %v390_v13, 1 }
  0x94   :  { %vm392_vm11 = vmpackc.low %vm391_vm10, %vm391_vm10 }
  0x97   :  { %v86_v42 = vpop.permute.xlu0 %85 }
  0x98   :  { %vm98_vm14 = vcmp.eq.s32.totalorder %v68_v35, %v86_v42  ;;  %v717_v42 = vld [vmem:[#allocation5 + $0x18] sm:$0xff] }
  0x99   :  { %vm630_vm15 = vmpackc.low %vm98_vm14, %vm97_vm13 }
  0x9a   :  { %629 = vmatmul.msk.bf16.gmra.mxu0 %vm628_vm12, %v806_v38  ;;  %v416_v22 = vpop.permute.xlu1 %415 }
  0x9b   :  { %vm417_vm12 = vcmp.eq.s32.totalorder %v416_v22, 1 }
  0x9c   :  { %vm418_vm13 = vmpackc.low %vm417_vm12, %vm417_vm12 }
  0x9f   :  { %v92_v44 = vpop.permute.xlu0 %91 }
  0xa0   :  { %vm100_vm1 = vcmp.eq.s32.totalorder %v68_v35, %v92_v44 }
  0xa1   :  { %vm632_vm2 = vmpackc.low %vm100_vm1, %vm99_vm0 }
  0xa2   :  { %v442_v31 = vpop.permute.xlu1 %441 }
  0xa3   :  { %vm443_vm14 = vcmp.eq.s32.totalorder %v442_v31, 1 }
  0xaa   :  { %631 = vmatmul.msk.bf16.gmra.mxu0 %vm630_vm15, %v806_v38  ;;  %v301_v45 = vpop.f32.mrf.mxu1  ;;  %vm444_vm15 = vmpackc.low %vm443_vm14, %vm443_vm14 }
  0xb2   :  { %v303_v46 = vpop.f32.mrf.mxu1 }
  0xb3   :  { %v468_v46 = vpop.permute.xlu2 %467 }
  0xb4   :  { %vm469_vm0 = vcmp.eq.s32.totalorder %v468_v46, 1 }
  0xb5   :  { %vm470_vm1 = vmpackc.low %vm469_vm0, %vm469_vm0 }
  0xba   :  { %633 = vmatmul.msk.bf16.gmra.mxu0 %vm632_vm2, %v806_v38  ;;  %v720_v38 = vld [vmem:[#allocation5 + $0x30] sm:$0xff] }
 0x107   :  { %v198_v48 = vpop.f32.mrf.mxu0 }
 0x108   :  { %v199_v49 = vadd.f32 %v1007_v47, %v198_v48 }
 0x10a   :  { %v305_v50 = vadd.f32 %v301_v45, %v199_v49 }
 0x10c   :  { %733 = vtanh.f32 %v305_v50 }
 0x10f   :  { %v200_v56 = vpop.f32.mrf.mxu0 }
 0x110   :  { %v201_v57 = vadd.f32 %v1007_v47, %v200_v56 }
 0x112   :  { %v734_v52 = vpop.eup %733 }
 0x113   :  { %v307_v53 = vpack.c.bf16 %v734_v52, %v734_v52  ;;  %v716_v52 = vld [vmem:[#allocation5 + $0x10] sm:$0xff] }
 0x115   :  { %v315_v54 = vsel %vm314_vm4, %v307_v53, 0  ;;  %v715_v53 = vld [vmem:[#allocation5 + $0x8] sm:$0xff] }
 0x116   :  { %326 = vmatmul.bf16.vlgmr.msra.gmra.mxu2 %v315_v54 }
 0x117   :  { %v203_v2 = vpop.f32.mrf.mxu0  ;;  %566 = vmatpush.bf16.msra.mxu2 %v721_v36 }
 0x118   :  { %v204_v3 = vadd.f32 %v1007_v47, %v203_v2 }
 0x11b   :  { %567 = vmatpush.bf16.msra.mxu2 %v720_v38 }
 0x11f   :  { %v205_v9 = vpop.f32.mrf.mxu0  ;;  %568 = vmatpush.bf16.msra.mxu2 %v719_v39 }
 0x120   :  { %v206_v10 = vadd.f32 %v1007_v47, %v205_v9 }
 0x123   :  { %569 = vmatpush.bf16.msra.mxu2 %v718_v40 }
 0x127   :  { %v208_v18 = vpop.f32.mrf.mxu0  ;;  %570 = vmatpush.bf16.msra.mxu2 %v717_v42 }
 0x128   :  { %v209_v19 = vadd.f32 %v1007_v47, %v208_v18 }
 0x12b   :  { %571 = vmatpush.bf16.msra.mxu2 %v716_v52 }
 0x12f   :  { %v210_v27 = vpop.f32.mrf.mxu0  ;;  %572 = vmatpush.bf16.msra.mxu2 %v715_v53 }
 0x130   :  { %v211_v28 = vadd.f32 %v1007_v47, %v210_v27 }
 0x137   :  { %v213_v37 = vpop.f32.mrf.mxu0 }
 0x138   :  { %v214_v43 = vadd.f32 %v1007_v47, %v213_v37 }
 0x13f   :  { %v215_v41 = vpop.f32.mrf.mxu0 }
 0x140   :  { %v216_v55 = vadd.f32 %v1007_v47, %v215_v41 }
 0x199   :  { %v327_v58 = vpop.f32.mrf.mxu2 }
 0x19a   :  { %v331_v59 = vadd.f32 %v327_v58, %v201_v57  ;;  %v494_v58 = vpop.permute.xlu0 %493 }
 0x19b   :  { %vm495_vm2 = vcmp.eq.s32.totalorder %v494_v58, 1 }
 0x19c   :  { %735 = vtanh.f32 %v331_v59  ;;  %vm496_vm3 = vmpackc.low %vm495_vm2, %vm495_vm2 }
 0x1a1   :  { %v329_v61 = vpop.f32.mrf.mxu2 }
 0x1a2   :  { %v736_v62 = vpop.eup %735 }
 0x1a3   :  { %v333_v63 = vpack.c.bf16 %v736_v62, %v736_v62 }
 0x1a5   :  { %v341_v1 = vsel %vm340_vm7, %v333_v63, %v315_v54  ;;  %v714_v54 = vld [vmem:[#allocation5] sm:$0xff] }
 0x1a6   :  { %352 = vmatmul.bf16.vlgmr.msra.gmra.mxu3 %v341_v1  ;;  %573 = vmatpush.bf16.msra.mxu2 %v714_v54  ;;  %v732_v63 = vld [vmem:[%s1031_s6] ss:$0 sm:$0xff] }
 0x229   :  { %v353_v4 = vpop.f32.mrf.mxu3 }
 0x22a   :  { %v357_v0 = vadd.f32 %v353_v4, %v204_v3 }
 0x22c   :  { %737 = vtanh.f32 %v357_v0 }
 0x231   :  { %v355_v5 = vpop.f32.mrf.mxu3 }
 0x232   :  { %v738_v6 = vpop.eup %737 }
 0x233   :  { %v359_v7 = vpack.c.bf16 %v738_v6, %v738_v6 }
 0x235   :  { %v367_v8 = vsel %vm366_vm9, %v359_v7, %v341_v1 }
 0x236   :  { %378 = vmatmul.bf16.vlgmr.msrb.gmra.mxu1 %v367_v8 }
 0x2b3   :  { %v379_v11 = vpop.f32.mrf.mxu1 }
 0x2b4   :  { %v383_v12 = vadd.f32 %v379_v11, %v206_v10 }
 0x2b6   :  { %739 = vtanh.f32 %v383_v12 }
 0x2bb   :  { %v381_v14 = vpop.f32.mrf.mxu1 }
 0x2bc   :  { %v740_v15 = vpop.eup %739 }
 0x2bd   :  { %v385_v16 = vpack.c.bf16 %v740_v15, %v740_v15 }
 0x2bf   :  { %v393_v17 = vsel %vm392_vm11, %v385_v16, %v367_v8 }
 0x2c0   :  { %404 = vmatmul.bf16.vlgmr.msrb.gmra.mxu2 %v393_v17 }
 0x343   :  { %v405_v20 = vpop.f32.mrf.mxu2 }
 0x344   :  { %v409_v21 = vadd.f32 %v405_v20, %v209_v19 }
 0x346   :  { %741 = vtanh.f32 %v409_v21 }
 0x34b   :  { %v407_v23 = vpop.f32.mrf.mxu2 }
 0x34c   :  { %v742_v24 = vpop.eup %741 }
 0x34d   :  { %v411_v25 = vpack.c.bf16 %v742_v24, %v742_v24 }
 0x34f   :  { %v419_v26 = vsel %vm418_vm13, %v411_v25, %v393_v17 }
 0x350   :  { %430 = vmatmul.bf16.vlgmr.msrb.gmra.mxu3 %v419_v26 }
 0x3d3   :  { %v431_v29 = vpop.f32.mrf.mxu3 }
 0x3d4   :  { %v435_v30 = vadd.f32 %v431_v29, %v211_v28 }
 0x3d6   :  { %743 = vtanh.f32 %v435_v30 }
 0x3db   :  { %v433_v32 = vpop.f32.mrf.mxu3 }
 0x3dc   :  { %v744_v33 = vpop.eup %743 }
 0x3dd   :  { %v437_v34 = vpack.c.bf16 %v744_v33, %v744_v33 }
 0x3df   :  { %v445_v35 = vsel %vm444_vm15, %v437_v34, %v419_v26 }
 0x3e0   :  { %456 = vmatmul.bf16.vlgmr.msrb.gmra.mxu0 %v445_v35 }
 0x45d   :  { %v457_v44 = vpop.f32.mrf.mxu0 }
 0x45e   :  { %v461_v45 = vadd.f32 %v457_v44, %v214_v43 }
 0x460   :  { %745 = vtanh.f32 %v461_v45 }
 0x465   :  { %v459_v48 = vpop.f32.mrf.mxu0 }
 0x466   :  { %v746_v49 = vpop.eup %745 }
 0x467   :  { %v463_v50 = vpack.c.bf16 %v746_v49, %v746_v49 }
 0x469   :  { %v471_v51 = vsel %vm470_vm1, %v463_v50, %v445_v35 }
 0x46a   :  { %482 = vmatmul.bf16.vlgmr.msra.gmra.mxu1 %v471_v51 }
 0x4e7   :  { %v483_v56 = vpop.f32.mrf.mxu1 }
 0x4e8   :  { %v487_v57 = vadd.f32 %v483_v56, %v216_v55 }
 0x4ea   :  { %747 = vtanh.f32 %v487_v57 }
 0x4ef   :  { %v485_v59 = vpop.f32.mrf.mxu1 }
 0x4f0   :  { %v748_v60 = vpop.eup %747 }
 0x4f1   :  { %v489_v61 = vpack.c.bf16 %v748_v60, %v748_v60 }
 0x4f3   :  { %v497_v62 = vsel %vm496_vm3, %v489_v61, %v471_v51 }
 0x4f4   :  { %574 = vmatmul.bf16.vlgmr.msra.gmra.mxu2 %v497_v62 }
 0x577   :  { %v575_v1 = vpop.f32.mrf.mxu2 }
 0x578   :  { %v576_v2 = vadd.f32 %v732_v63, %v575_v1 }
 0x57a   :  { %579 = vst [vmem:[%s1032_s7] sm:$0xff] %v576_v2 }
 0x57f   :  { %v577_v47 = vpop.f32.mrf.mxu2 }
 0x580   :  { %584 = vsyncpa [#allocation4], 1 }
 0x581   :  { %585 = vsyncpa [#allocation6], 1 }

</bundles_post_ra>
